<compile_context>
chip_gen: v6e
topology: v6e:2x2x1
jax: 0.10.0
libtpu: 0.0.40
codegen_flags: <defaults>
</compile_context>

<pallas_src>
import jax
import jax.numpy as jnp
from jax.experimental import pallas as pl
from jax.experimental.pallas import tpu as pltpu

_MIB = 1024 * 1024
_TARGET_BLOCK_BYTES = 4 * _MIB       # per-grid-step DMA target (fused & streaming)
_CHUNK_F32_BYTES = 2 * _MIB          # bound for in-kernel f32 temps (fused path)
_MXU_C_THRESHOLD = 64                # switch streaming reduce to MXU for large C


# ---------------------------------------------------------------------------
# Fused kernel: Bt batch elements' full (C, HW) slabs resident in VMEM.
#   GAP -> conv1(1x1) -> ReLU -> conv2(1x1) -> softmax(C) -> weighted sum
# The f32 cast is folded into chunked reductions so no full-slab f32 temp is
# ever materialized; the tiny MLP stays on the VPU (broadcast-mul + reduce).
# ---------------------------------------------------------------------------
def _make_fused_kernel(bt, c, hw, chunk):
    inv_hw = 1.0 / float(hw)

    def kernel(x_ref, w1t_ref, b1_ref, w2_ref, b2_ref, o_ref):
        # Hoist the tiny parameters once (loop-invariant).
        w1t = w1t_ref[...]                                     # (C, C2) f32
        b1v = b1_ref[...]                                      # (1, C2)
        w2v = w2_ref[...]                                      # (C, C2)
        b2v = b2_ref[...]                                      # (C, 1)

        for b in range(bt):                                    # static unroll
            # --- AdaptiveAvgPool2d(1): chunked lane-axis reduction, cast folded
            gap = jnp.zeros((c, 1), jnp.float32)
            for s in range(0, hw, chunk):
                hi = min(s + chunk, hw)
                gap = gap + jnp.sum(x_ref[b, :, s:hi].astype(jnp.float32),
                                    axis=1, keepdims=True)
            gap = gap * inv_hw                                 # (C, 1)

            # --- conv1 (1x1) + ReLU:  h_j = relu(sum_i w1[j,i]*gap_i + b1_j)
            h = jnp.sum(w1t * gap, axis=0, keepdims=True) + b1v   # (1, C2)
            h = jnp.maximum(h, 0.0)

            # --- conv2 (1x1):  logits_k = sum_j w2[k,j]*h_j + b2_k
            logits = jnp.sum(w2v * h, axis=1, keepdims=True) + b2v  # (C, 1)

            # --- softmax over channels (PyTorch dim=1 in NCHW)
            m = jnp.max(logits, axis=0, keepdims=True)
            ex = jnp.exp(logits - m)
            r = ex / jnp.sum(ex, axis=0, keepdims=True)        # (C, 1)

            # --- weighted channel sum, chunk at a time (bounded f32 temps)
            for s in range(0, hw, chunk):
                hi = min(s + chunk, hw)
                xa = x_ref[b, :, s:hi].astype(jnp.float32)     # (C, chunk)
                o_ref[b, :, s:hi] = jnp.sum(
                    xa * r, axis=0, keepdims=True).astype(o_ref.dtype)

    return kernel


# ---------------------------------------------------------------------------
# Streaming kernels (split path): softmax weights r precomputed outside; just
# stream lane-dense spatial tiles and do the channel-weighted sum.
# ---------------------------------------------------------------------------
def _weighted_sum_vpu_kernel(r_ref, x_ref, o_ref):
    x = x_ref[0].astype(jnp.float32)                           # (C, T)
    o_ref[0] = jnp.sum(x * r_ref[0], axis=0,
                       keepdims=True).astype(o_ref.dtype)      # (1, T)


def _weighted_sum_mxu_kernel(r_ref, x_ref, o_ref):
    x = x_ref[0].astype(jnp.float32)                           # (C, T)
    o_ref[0] = jnp.dot(r_ref[0], x,                            # (1,C)@(C,T)
                       preferred_element_type=jnp.float32).astype(o_ref.dtype)


# ---------------------------------------------------------------------------
# Sizing helpers (per TPU generation).
# ---------------------------------------------------------------------------
def _vmem_capacity_bytes():
    try:
        info = pltpu.get_tpu_info()
        for name in ("vmem_capacity_bytes", "vmem_bytes", "vmem_size_bytes"):
            v = getattr(info, name, None)
            if v:
                return int(v)
    except Exception:
        pass
    return 64 * _MIB                     # conservative default (v7x-sized)


def _vmem_budgets():
    cap = _vmem_capacity_bytes()
    if cap >= 96 * _MIB:                 # v5e / v6e: 128 MiB physical VMEM
        vmem_limit = 96 * _MIB
    else:                                # v7x: 64 MiB physical VMEM
        vmem_limit = max(16 * _MIB, min(48 * _MIB, cap - 16 * _MIB))
    fused_budget = vmem_limit - 8 * _MIB  # headroom for compiler scratch
    return vmem_limit, fused_budget


def _pick_batch_tile(b, per_b_bytes):
    """Largest divisor of b such that the fused block is ~_TARGET_BLOCK_BYTES."""
    best = 1
    for d in range(1, b + 1):
        if b % d == 0 and d * per_b_bytes <= _TARGET_BLOCK_BYTES:
            best = d
    return best


def _pick_spatial_tile(hw, c, itemsize):
    """Streaming tile: lane-dense, ~_TARGET_BLOCK_BYTES of x per grid step."""
    if c * hw * itemsize <= _TARGET_BLOCK_BYTES:
        return hw                                    # single full-extent tile
    t_max = max(128, (_TARGET_BLOCK_BYTES // (c * itemsize)) // 128 * 128)
    if t_max >= hw:
        return hw
    for t in range(t_max, 127, -128):                # prefer a divisor of HW
        if hw % t == 0:
            return t
    return t_max                                     # boundary block is masked


def _pick_chunk(hw, c):
    """In-kernel spatial chunk so (C, CHUNK) f32 temps stay <= _CHUNK_F32_BYTES."""
    if c * hw * 4 <= _CHUNK_F32_BYTES:
        return hw
    return max(128, (_CHUNK_F32_BYTES // (c * 4)) // 128 * 128)


# ---------------------------------------------------------------------------
# Public entry point: Predict_PAN.forward
# ---------------------------------------------------------------------------
def predict_pan(net_output, w1, b1, w2, b2, mode="GAP", *, force_streaming=False):
    """Pallas implementation of Predict_PAN.forward.

    net_output: (B, C, H, W), any float dtype (kept as-is in HBM).
    w1: (C//2, C), b1: (C//2,)  -- conv1 (1x1) weight/bias
    w2: (C, C//2), b2: (C,)     -- conv2 (1x1) weight/bias
    Returns (B, H, W) in net_output.dtype.
    """
    if mode == "MEAN":
        # Trivial channel mean; plain-JAX glue.
        return jnp.mean(net_output, axis=1)

    B, C, H, W = net_output.shape
    HW = H * W
    C2 = w1.shape[0]
    out_dtype = net_output.dtype
    itemsize = jnp.dtype(out_dtype).itemsize

    # Lane-dense layout: last dim is the full spatial extent.
    x3 = net_output.reshape(B, C, HW)

    w1 = w1.astype(jnp.float32)
    b1 = b1.astype(jnp.float32)
    w2 = w2.astype(jnp.float32)
    b2 = b2.astype(jnp.float32)

    vmem_limit, fused_budget = _vmem_budgets()

    per_b_bytes = C * HW * itemsize
    Bt = _pick_batch_tile(B, per_b_bytes) if per_b_bytes < _TARGET_BLOCK_BYTES else 1
    chunk = _pick_chunk(HW, C)
    # Real in-kernel working set: double-buffered input + output blocks plus
    # the bounded f32 chunk temps and the tiny MLP parameters.
    working_set = (2 * Bt * per_b_bytes              # input (double-buffered)
                   + 2 * Bt * HW * itemsize          # output (double-buffered)
                   + 4 * C * chunk * 4               # chunked f32 temps (+slack)
                   + 4 * (2 * C * C2 + C2 + C) * 4)  # params
    use_fused = (not force_streaming) and working_set <= fused_budget

    x_bytes = int(x3.size) * itemsize
    out_bytes = B * HW * itemsize

    if use_fused:
        cost = pl.CostEstimate(
            flops=3 * B * C * HW + 4 * B * C * C2,
            transcendentals=B * C,
            bytes_accessed=x_bytes + out_bytes,
        )
        out = pl.pallas_call(
            _make_fused_kernel(Bt, C, HW, chunk),
            out_shape=jax.ShapeDtypeStruct((B, 1, HW), out_dtype),
            grid_spec=pltpu.PrefetchScalarGridSpec(
                num_scalar_prefetch=0,
                grid=(B // Bt,),
                in_specs=[
                    pl.BlockSpec((Bt, C, HW), lambda i: (i, 0, 0)),   # x block
                    pl.BlockSpec((C, C2), lambda i: (0, 0)),          # w1^T
                    pl.BlockSpec((1, C2), lambda i: (0, 0)),          # b1 (row)
                    pl.BlockSpec((C, C2), lambda i: (0, 0)),          # w2
                    pl.BlockSpec((C, 1), lambda i: (0, 0)),           # b2 (col)
                ],
                out_specs=pl.BlockSpec((Bt, 1, HW), lambda i: (i, 0, 0)),
            ),
            compiler_params=pltpu.CompilerParams(
                dimension_semantics=("parallel",),
                vmem_limit_bytes=vmem_limit,
            ),
            cost_estimate=cost,
        )(x3, w1.T, b1.reshape(1, C2), w2, b2.reshape(C, 1))
        return out.reshape(B, H, W)

    # ---- Split path (very large slabs): softmax channel weights in plain JAX
    # (O(B*C*(HW+C2)) work, negligible), then a Pallas stream of lane-dense
    # ~4 MiB tiles doing the weighted channel sum (default depth-2 pipeline).
    gap = jnp.mean(x3.astype(jnp.float32), axis=2)             # (B, C)
    h = jnp.maximum(gap @ w1.T + b1, 0.0)                      # (B, C2)
    logits = h @ w2.T + b2                                     # (B, C)
    r = jax.nn.softmax(logits, axis=1)                         # (B, C) f32

    use_mxu = C >= _MXU_C_THRESHOLD
    if use_mxu:
        r3 = r[:, None, :]                                     # (B, 1, C)
        r_spec = pl.BlockSpec((1, 1, C), lambda b, t: (b, 0, 0))
        kernel = _weighted_sum_mxu_kernel
    else:
        r3 = r[:, :, None]                                     # (B, C, 1)
        r_spec = pl.BlockSpec((1, C, 1), lambda b, t: (b, 0, 0))
        kernel = _weighted_sum_vpu_kernel

    T = _pick_spatial_tile(HW, C, itemsize)
    n_t = pl.cdiv(HW, T)
    # Advisory: includes the extra full read of x done by the plain-JAX GAP.
    cost = pl.CostEstimate(
        flops=3 * B * C * HW + 4 * B * C * C2,
        transcendentals=B * C,
        bytes_accessed=2 * x_bytes + out_bytes,
    )
    out = pl.pallas_call(
        kernel,
        out_shape=jax.ShapeDtypeStruct((B, 1, HW), out_dtype),
        grid_spec=pltpu.PrefetchScalarGridSpec(
            num_scalar_prefetch=0,
            grid=(B, n_t),
            in_specs=[r_spec,
                      pl.BlockSpec((1, C, T), lambda b, t: (b, 0, t))],
            out_specs=pl.BlockSpec((1, 1, T), lambda b, t: (b, 0, t)),
        ),
        compiler_params=pltpu.CompilerParams(
            dimension_semantics=("parallel", "parallel"),
            vmem_limit_bytes=vmem_limit,
        ),
        cost_estimate=cost,
    )(r3, x3)
    return out.reshape(B, H, W)


if __name__ == "__main__":
    key = jax.random.PRNGKey(0)

    def reference(x, w1, b1, w2, b2):
        # Plain-JAX reference of the PyTorch forward (GAP mode).
        gap = jnp.mean(x.astype(jnp.float32), axis=(2, 3))        # (B, C)
        h = jnp.maximum(gap @ w1.T + b1, 0.0)                     # (B, C2)
        logits = h @ w2.T + b2                                    # (B, C)
        rwt = jax.nn.softmax(logits, axis=1)                      # (B, C)
        return jnp.sum(x.astype(jnp.float32) * rwt[:, :, None, None], axis=1)

    # --- small case (spectral_bands = 4, r = 2 -> C2 = 2) --------------------
    B, C, H, W = 2, 4, 16, 16
    C2 = C // 2
    k1, k2, k3, k4, k5 = jax.random.split(key, 5)
    x = jax.random.normal(k1, (B, C, H, W), dtype=jnp.float32)
    w1 = jax.random.normal(k2, (C2, C), dtype=jnp.float32) * 0.5
    b1 = jax.random.normal(k3, (C2,), dtype=jnp.float32) * 0.1
    w2 = jax.random.normal(k4, (C, C2), dtype=jnp.float32) * 0.5
    b2 = jax.random.normal(k5, (C,), dtype=jnp.float32) * 0.1
    ref = reference(x, w1, b1, w2, b2)

    # Fused single-read path (small slab, Bt batch elements per grid step).
    out_fused = jax.block_until_ready(predict_pan(x, w1, b1, w2, b2, mode="GAP"))
    assert out_fused.shape == (B, H, W)
    assert jnp.allclose(out_fused, ref, atol=1e-5, rtol=1e-5), "fused path mismatch"

    # Streaming (split) path used for very large images -- force it to verify.
    out_stream = jax.block_until_ready(
        predict_pan(x, w1, b1, w2, b2, mode="GAP", force_streaming=True))
    assert jnp.allclose(out_stream, ref, atol=1e-5, rtol=1e-5), "streaming path mismatch"

    # bf16 input pass-through (halves HBM traffic); output stays in input dtype.
    out_bf16 = jax.block_until_ready(
        predict_pan(x.astype(jnp.bfloat16), w1, b1, w2, b2, mode="GAP"))
    assert out_bf16.dtype == jnp.bfloat16
    assert jnp.allclose(out_bf16.astype(jnp.float32), ref, atol=1e-1, rtol=5e-2), \
        "bf16 path mismatch"

    # MEAN mode (plain-JAX glue, matches torch.mean over channels).
    out_mean = jax.block_until_ready(predict_pan(x, w1, b1, w2, b2, mode="MEAN"))
    assert jnp.allclose(out_mean, jnp.mean(x, axis=1), atol=1e-6), "MEAN mode mismatch"

    # --- large-C case to exercise the MXU streaming contraction --------------
    Bl, Cl, Hl, Wl = 1, 64, 16, 32
    Cl2 = Cl // 2
    k6, k7, k8, k9, k10 = jax.random.split(jax.random.PRNGKey(1), 5)
    xl = jax.random.normal(k6, (Bl, Cl, Hl, Wl), dtype=jnp.float32)
    w1l = jax.random.normal(k7, (Cl2, Cl), dtype=jnp.float32) * 0.1
    b1l = jax.random.normal(k8, (Cl2,), dtype=jnp.float32) * 0.1
    w2l = jax.random.normal(k9, (Cl, Cl2), dtype=jnp.float32) * 0.1
    b2l = jax.random.normal(k10, (Cl,), dtype=jnp.float32) * 0.1
    refl = reference(xl, w1l, b1l, w2l, b2l)
    out_mxu = jax.block_until_ready(
        predict_pan(xl, w1l, b1l, w2l, b2l, mode="GAP", force_streaming=True))
    # MXU f32 matmul may run at reduced internal precision -> loose tolerance.
    assert jnp.allclose(out_mxu, refl, atol=5e-3, rtol=1e-2), "MXU streaming mismatch"

    print("KERNEL_OK")
</pallas_src>

<mosaic_0001>
module attributes {stable_mosaic.version = 11 : i64} {
  func.func @kernel(%arg0: i32, %arg1: memref<2x4x256xf32, #tpu.memory_space<vmem>>, %arg2: memref<4x2xf32, #tpu.memory_space<vmem>>, %arg3: memref<1x2xf32, #tpu.memory_space<vmem>>, %arg4: memref<4x2xf32, #tpu.memory_space<vmem>>, %arg5: memref<4x1xf32, #tpu.memory_space<vmem>>, %arg6: memref<2x1x256xf32, #tpu.memory_space<vmem>>) attributes {dimension_semantics = [#tpu.dimension_semantics<parallel>], iteration_bounds = array<i64: 1>, scalar_prefetch = 0 : i64, scratch_operands = 0 : i64, tpu.core_type = #tpu.core_type<tc>, window_params = [{transform_indices = @transform_0, window_bounds = array<i64: 2, 4, 256>}, {pipeline_mode = #tpu.pipeline_mode<synchronous>, transform_indices = @transform_1, window_bounds = array<i64: 4, 2>}, {pipeline_mode = #tpu.pipeline_mode<synchronous>, transform_indices = @transform_2, window_bounds = array<i64: 1, 2>}, {pipeline_mode = #tpu.pipeline_mode<synchronous>, transform_indices = @transform_3, window_bounds = array<i64: 4, 2>}, {pipeline_mode = #tpu.pipeline_mode<synchronous>, transform_indices = @transform_4, window_bounds = array<i64: 4, 1>}, {transform_indices = @transform_5, window_bounds = array<i64: 2, 1, 256>}]} {
    %c0 = arith.constant 0 : index
    %c0_0 = arith.constant 0 : index
    %0 = vector.load %arg2[%c0, %c0_0] : memref<4x2xf32, #tpu.memory_space<vmem>>, vector<4x2xf32>
    %c0_1 = arith.constant 0 : index
    %c0_2 = arith.constant 0 : index
    %1 = vector.load %arg3[%c0_1, %c0_2] : memref<1x2xf32, #tpu.memory_space<vmem>>, vector<1x2xf32>
    %c0_3 = arith.constant 0 : index
    %c0_4 = arith.constant 0 : index
    %2 = vector.load %arg4[%c0_3, %c0_4] : memref<4x2xf32, #tpu.memory_space<vmem>>, vector<4x2xf32>
    %c0_5 = arith.constant 0 : index
    %c0_6 = arith.constant 0 : index
    %3 = vector.load %arg5[%c0_5, %c0_6] : memref<4x1xf32, #tpu.memory_space<vmem>>, vector<4x1xf32>
    %cst = arith.constant 0.000000e+00 : f32
    %4 = vector.broadcast %cst : f32 to vector<4x1xf32>
    %c0_7 = arith.constant 0 : index
    %c0_8 = arith.constant 0 : index
    %c0_9 = arith.constant 0 : index
    %5 = vector.load %arg1[%c0_7, %c0_8, %c0_9] : memref<2x4x256xf32, #tpu.memory_space<vmem>>, vector<1x4x256xf32>
    %6 = vector.shape_cast %5 : vector<1x4x256xf32> to vector<4x256xf32>
    %cst_10 = arith.constant dense<0.000000e+00> : vector<4xf32>
    %7 = vector.multi_reduction <add>, %6, %cst_10 [1] : vector<4x256xf32> to vector<4xf32>
    %8 = vector.shape_cast %7 : vector<4xf32> to vector<4x1xf32>
    %9 = arith.addf %4, %8 : vector<4x1xf32>
    %cst_11 = arith.constant 3.906250e-03 : f32
    %10 = vector.broadcast %cst_11 : f32 to vector<4x1xf32>
    %11 = arith.mulf %9, %10 : vector<4x1xf32>
    %12 = vector.broadcast %11 : vector<4x1xf32> to vector<4x2xf32>
    %13 = arith.mulf %0, %12 : vector<4x2xf32>
    %cst_12 = arith.constant dense<0.000000e+00> : vector<2xf32>
    %14 = vector.multi_reduction <add>, %13, %cst_12 [0] : vector<4x2xf32> to vector<2xf32>
    %15 = vector.shape_cast %14 : vector<2xf32> to vector<1x2xf32>
    %16 = arith.addf %15, %1 : vector<1x2xf32>
    %cst_13 = arith.constant 0.000000e+00 : f32
    %17 = vector.broadcast %cst_13 : f32 to vector<1x2xf32>
    %18 = arith.maximumf %16, %17 : vector<1x2xf32>
    %19 = vector.broadcast %18 : vector<1x2xf32> to vector<4x2xf32>
    %20 = arith.mulf %2, %19 : vector<4x2xf32>
    %cst_14 = arith.constant dense<0.000000e+00> : vector<4xf32>
    %21 = vector.multi_reduction <add>, %20, %cst_14 [1] : vector<4x2xf32> to vector<4xf32>
    %22 = vector.shape_cast %21 : vector<4xf32> to vector<4x1xf32>
    %23 = arith.addf %22, %3 : vector<4x1xf32>
    %cst_15 = arith.constant dense<0xFF800000> : vector<1xf32>
    %24 = vector.multi_reduction <maximumf>, %23, %cst_15 [0] : vector<4x1xf32> to vector<1xf32>
    %25 = vector.shape_cast %24 : vector<1xf32> to vector<1x1xf32>
    %26 = vector.broadcast %25 : vector<1x1xf32> to vector<4x1xf32>
    %27 = arith.subf %23, %26 : vector<4x1xf32>
    %28 = math.exp %27 : vector<4x1xf32>
    %cst_16 = arith.constant dense<0.000000e+00> : vector<1xf32>
    %29 = vector.multi_reduction <add>, %28, %cst_16 [0] : vector<4x1xf32> to vector<1xf32>
    %30 = vector.shape_cast %29 : vector<1xf32> to vector<1x1xf32>
    %31 = vector.broadcast %30 : vector<1x1xf32> to vector<4x1xf32>
    %32 = arith.divf %28, %31 : vector<4x1xf32>
    %c0_17 = arith.constant 0 : index
    %c0_18 = arith.constant 0 : index
    %c0_19 = arith.constant 0 : index
    %33 = vector.load %arg1[%c0_17, %c0_18, %c0_19] : memref<2x4x256xf32, #tpu.memory_space<vmem>>, vector<1x4x256xf32>
    %34 = vector.shape_cast %33 : vector<1x4x256xf32> to vector<4x256xf32>
    %35 = vector.broadcast %32 : vector<4x1xf32> to vector<4x256xf32>
    %36 = arith.mulf %34, %35 : vector<4x256xf32>
    %cst_20 = arith.constant dense<0.000000e+00> : vector<256xf32>
    %37 = vector.multi_reduction <add>, %36, %cst_20 [0] : vector<4x256xf32> to vector<256xf32>
    %38 = vector.shape_cast %37 : vector<256xf32> to vector<1x256xf32>
    %c0_21 = arith.constant 0 : index
    %c0_22 = arith.constant 0 : index
    %c0_23 = arith.constant 0 : index
    %39 = vector.load %arg6[%c0_21, %c0_22, %c0_23] : memref<2x1x256xf32, #tpu.memory_space<vmem>>, vector<1x1x256xf32>
    %40 = vector.shape_cast %39 : vector<1x1x256xf32> to vector<1x256xf32>
    %41 = vector.shape_cast %38 : vector<1x256xf32> to vector<1x1x256xf32>
    tpu.vector_store %arg6[%c0_21, %c0_22, %c0_23], %41 {strides = array<i32>} : memref<2x1x256xf32, #tpu.memory_space<vmem>>, vector<1x1x256xf32>,
    %cst_24 = arith.constant 0.000000e+00 : f32
    %42 = vector.broadcast %cst_24 : f32 to vector<4x1xf32>
    %c1 = arith.constant 1 : index
    %c0_25 = arith.constant 0 : index
    %c0_26 = arith.constant 0 : index
    %43 = vector.load %arg1[%c1, %c0_25, %c0_26] : memref<2x4x256xf32, #tpu.memory_space<vmem>>, vector<1x4x256xf32>
    %44 = vector.shape_cast %43 : vector<1x4x256xf32> to vector<4x256xf32>
    %cst_27 = arith.constant dense<0.000000e+00> : vector<4xf32>
    %45 = vector.multi_reduction <add>, %44, %cst_27 [1] : vector<4x256xf32> to vector<4xf32>
    %46 = vector.shape_cast %45 : vector<4xf32> to vector<4x1xf32>
    %47 = arith.addf %42, %46 : vector<4x1xf32>
    %cst_28 = arith.constant 3.906250e-03 : f32
    %48 = vector.broadcast %cst_28 : f32 to vector<4x1xf32>
    %49 = arith.mulf %47, %48 : vector<4x1xf32>
    %50 = vector.broadcast %49 : vector<4x1xf32> to vector<4x2xf32>
    %51 = arith.mulf %0, %50 : vector<4x2xf32>
    %cst_29 = arith.constant dense<0.000000e+00> : vector<2xf32>
    %52 = vector.multi_reduction <add>, %51, %cst_29 [0] : vector<4x2xf32> to vector<2xf32>
    %53 = vector.shape_cast %52 : vector<2xf32> to vector<1x2xf32>
    %54 = arith.addf %53, %1 : vector<1x2xf32>
    %cst_30 = arith.constant 0.000000e+00 : f32
    %55 = vector.broadcast %cst_30 : f32 to vector<1x2xf32>
    %56 = arith.maximumf %54, %55 : vector<1x2xf32>
    %57 = vector.broadcast %56 : vector<1x2xf32> to vector<4x2xf32>
    %58 = arith.mulf %2, %57 : vector<4x2xf32>
    %cst_31 = arith.constant dense<0.000000e+00> : vector<4xf32>
    %59 = vector.multi_reduction <add>, %58, %cst_31 [1] : vector<4x2xf32> to vector<4xf32>
    %60 = vector.shape_cast %59 : vector<4xf32> to vector<4x1xf32>
    %61 = arith.addf %60, %3 : vector<4x1xf32>
    %cst_32 = arith.constant dense<0xFF800000> : vector<1xf32>
    %62 = vector.multi_reduction <maximumf>, %61, %cst_32 [0] : vector<4x1xf32> to vector<1xf32>
    %63 = vector.shape_cast %62 : vector<1xf32> to vector<1x1xf32>
    %64 = vector.broadcast %63 : vector<1x1xf32> to vector<4x1xf32>
    %65 = arith.subf %61, %64 : vector<4x1xf32>
    %66 = math.exp %65 : vector<4x1xf32>
    %cst_33 = arith.constant dense<0.000000e+00> : vector<1xf32>
    %67 = vector.multi_reduction <add>, %66, %cst_33 [0] : vector<4x1xf32> to vector<1xf32>
    %68 = vector.shape_cast %67 : vector<1xf32> to vector<1x1xf32>
    %69 = vector.broadcast %68 : vector<1x1xf32> to vector<4x1xf32>
    %70 = arith.divf %66, %69 : vector<4x1xf32>
    %c1_34 = arith.constant 1 : index
    %c0_35 = arith.constant 0 : index
    %c0_36 = arith.constant 0 : index
    %71 = vector.load %arg1[%c1_34, %c0_35, %c0_36] : memref<2x4x256xf32, #tpu.memory_space<vmem>>, vector<1x4x256xf32>
    %72 = vector.shape_cast %71 : vector<1x4x256xf32> to vector<4x256xf32>
    %73 = vector.broadcast %70 : vector<4x1xf32> to vector<4x256xf32>
    %74 = arith.mulf %72, %73 : vector<4x256xf32>
    %cst_37 = arith.constant dense<0.000000e+00> : vector<256xf32>
    %75 = vector.multi_reduction <add>, %74, %cst_37 [0] : vector<4x256xf32> to vector<256xf32>
    %76 = vector.shape_cast %75 : vector<256xf32> to vector<1x256xf32>
    %c1_38 = arith.constant 1 : index
    %c0_39 = arith.constant 0 : index
    %c0_40 = arith.constant 0 : index
    %77 = vector.load %arg6[%c1_38, %c0_39, %c0_40] : memref<2x1x256xf32, #tpu.memory_space<vmem>>, vector<1x1x256xf32>
    %78 = vector.shape_cast %77 : vector<1x1x256xf32> to vector<1x256xf32>
    %79 = vector.shape_cast %76 : vector<1x256xf32> to vector<1x1x256xf32>
    tpu.vector_store %arg6[%c1_38, %c0_39, %c0_40], %79 {strides = array<i32>} : memref<2x1x256xf32, #tpu.memory_space<vmem>>, vector<1x1x256xf32>,
    return
  }
  func.func @transform_0(%arg0: i32) -> (i32, i32, i32) {
    %c0_i32 = arith.constant 0 : i32
    %c0_i32_0 = arith.constant 0 : i32
    %c0_i32_1 = arith.constant 0 : i32
    return %arg0, %c0_i32, %c0_i32_0 : i32, i32, i32
  }
  func.func @transform_1(%arg0: i32) -> (i32, i32) {
    %c0_i32 = arith.constant 0 : i32
    %c0_i32_0 = arith.constant 0 : i32
    %c0_i32_1 = arith.constant 0 : i32
    return %c0_i32, %c0_i32_0 : i32, i32
  }
  func.func @transform_2(%arg0: i32) -> (i32, i32) {
    %c0_i32 = arith.constant 0 : i32
    %c0_i32_0 = arith.constant 0 : i32
    %c0_i32_1 = arith.constant 0 : i32
    return %c0_i32, %c0_i32_0 : i32, i32
  }
  func.func @transform_3(%arg0: i32) -> (i32, i32) {
    %c0_i32 = arith.constant 0 : i32
    %c0_i32_0 = arith.constant 0 : i32
    %c0_i32_1 = arith.constant 0 : i32
    return %c0_i32, %c0_i32_0 : i32, i32
  }
  func.func @transform_4(%arg0: i32) -> (i32, i32) {
    %c0_i32 = arith.constant 0 : i32
    %c0_i32_0 = arith.constant 0 : i32
    %c0_i32_1 = arith.constant 0 : i32
    return %c0_i32, %c0_i32_0 : i32, i32
  }
  func.func @transform_5(%arg0: i32) -> (i32, i32, i32) {
    %c0_i32 = arith.constant 0 : i32
    %c0_i32_0 = arith.constant 0 : i32
    %c0_i32_1 = arith.constant 0 : i32
    return %arg0, %c0_i32, %c0_i32_0 : i32, i32, i32
  }
}

</mosaic_0001>

<bundles_post_ra>
// kernel: tpu_custom_call.1
= control target key start
LH: loop header
LB: loop body
LE: loop exit
PB: predicated region body
PF: predicated region fallthrough
CT: control target
= control target key end

     0   :  { %vm29_vm0 = vcmask 1043456   ;;  %s379_s0 = inlined_call_operand.vmem [shape: f32[2,4,256], index: 0, kind: input, shape index: {}]   ;;  %s380_s1 = inlined_call_operand.vmem [shape: f32[4,2], index: 1, kind: input, shape index: {}]   ;;  %s381_s2 = inlined_call_operand.vmem [shape: f32[1,2], index: 2, kind: input, shape index: {}]   ;;  %s382_s3 = inlined_call_operand.vmem [shape: f32[4,2], index: 3, kind: input, shape index: {}]   ;;  %s383_s4 = inlined_call_operand.vmem [shape: f32[4,1], index: 4, kind: input, shape index: {}]   ;;  %s384_s5 = inlined_call_operand.hbm [shape: f32[2,1,256], index: 5, kind: output, shape index: {}]  }
   0x1   :  { %v326_v0 = vld [vmem:[%s379_s0] sm:$0xff]  ;;  %v331_v1 = vld [vmem:[%s379_s0 + $0x8] sm:$0xff] }
   0x2   :  { %10 = vsyncpa [#allocation3], 0  ;;  %v27_v2 = vcombine.high %v326_v0, %v326_v0  ;;  %v30_v3 = vsel %vm29_vm0, %v326_v0, 0.0  ;;  %v133_v4 = vcombine.high %v331_v1, %v331_v1  ;;  %v135_v6 = vsel %vm29_vm0, %v331_v1, 0.0  ;;  %v21_v11 = vld [vmem:[%s380_s1] sm:$0xf] }
   0x3   :  { %vm38_vm1 = vcmask 11264   ;;  %v48_v22 = vlaneseq  ;;  %v22_v29 = vld [vmem:[%s381_s2] sm:$0x1]  ;;  %v287_v46 = vmov 0   ;;  %vm57_vm2 = vcmask 3072  }
   0x4   :  { %v31_v5 = vsel %vm29_vm0, %v27_v2, 0.0  ;;  %v136_v7 = vsel %vm29_vm0, %v133_v4, 0.0  ;;  %v23_v37 = vld [vmem:[%s382_s3] sm:$0xf]  ;;  %253 = vset.pattern.permute.xlu0 %v287_v46  ;;  %254 = vset.pattern.permute.xlu1 %v287_v46  ;;  %v289_v46 = vmov 1966171168  }
   0x5   :  { %v32_v8 = vadd.f32 %v31_v5, %v30_v3  ;;  %v137_v9 = vadd.f32 %v136_v7, %v135_v6  ;;  %v349_v27 = vshrl.u32 %v48_v22, 7  ;;  %v24_v47 = vld [vmem:[%s383_s4] sm:$0xf]  ;;  %vm127_vm3 = vcmp.lt.s32.totalorder %v48_v22, 256  ;;  %s290_s3 = smov [#allocation2]  }
   0x6   :  { %s235_s4 = sshll.u32 %s290_s3, 4  ;;  %s236_s4 = int_to_ptr.vmem [resolvable:$true] %s235_s4 }
   0x7   :  { %33 = vadd.xlane.f32.xlu0 %v32_v8  ;;  %v50_v33 = vsub.s32 0, %v349_v27  ;;  %s265_s27 = scalar_lea.vmem %s236_s4, 64  ;;  %p270_p1 = scmp.lt.s32.totalorder %s236_s4, %s236_s4 }
   0x8   :  { %p266_p0 = scmp.ne.s32.totalorder %s236_s4, %s265_s27  ;;  %p271_p2 = scmp.lt.s32.totalorder %s265_s27, %s265_s27 }
   0xa   :  { %p272_p3 = por %p271_p2, %p270_p1 }
   0xb   :  { %138 = vadd.xlane.f32.xlu0 %v137_v9 }
   0xc   :  { %p273_p4 = pnand %p272_p3, %p266_p0 }
  0x90   :  { %v34_v10 = vpop.xlane.xlu0 %33 }
  0x91   :  { %v36_v12 = vmul.f32 0.00390625, %v34_v10 }
  0x93   :  { %v37_v13 = vmul.f32 %v36_v12, %v21_v11 }
  0x94   :  { %v139_v14 = vpop.xlane.xlu0 %138 }
  0x95   :  { %v141_v15 = vmul.f32 0.00390625, %v139_v14  ;;  %v39_v16 = vsel %vm38_vm1, %v37_v13, 0.0 }
  0x96   :  { %v40_v17 = vrot.slane %v39_v16, 4 }
  0x97   :  { %v142_v18 = vmul.f32 %v141_v15, %v21_v11 }
  0x98   :  { %v41_v19 = vadd.f32 %v40_v17, %v39_v16 }
  0x99   :  { %v143_v20 = vsel %vm38_vm1, %v142_v18, 0.0 }
  0x9a   :  { %v42_v21 = vrot.slane %v41_v19, 2  ;;  %v144_v23 = vrot.slane %v143_v20, 4 }
  0x9c   :  { %v43_v24 = vadd.f32 %v42_v21, %v41_v19  ;;  %v145_v25 = vadd.f32 %v144_v23, %v143_v20 }
  0x9e   :  { %v44_v26 = vrot.slane %v43_v24, 1  ;;  %v146_v28 = vrot.slane %v145_v25, 2 }
  0xa0   :  { %v45_v30 = vadd.f32 %v44_v26, %v43_v24  ;;  %v147_v31 = vadd.f32 %v146_v28, %v145_v25 }
  0xa2   :  { %v46_v32 = vadd.f32 %v45_v30, %v22_v29  ;;  %v148_v34 = vrot.slane %v147_v31, 1  ;;  %v288_v30 = vmov 839922192  }
  0xa4   :  { %v47_v35 = vmax.f32 %v46_v32, 0.0  ;;  %v149_v36 = vadd.f32 %v148_v34, %v147_v31  ;;  %v82_v31 = vunpack.c.l.s4 %v288_v30 }
  0xa6   :  { %v51_v38 = vrot.slane %v47_v35, %v50_v33  ;;  %v150_v39 = vadd.f32 %v149_v36, %v22_v29  ;;  %v83_v32 = vunpack.c.0.s8 %v82_v31 }
  0xa8   :  { %v52_v40 = vmul.f32 %v51_v38, %v23_v37  ;;  %v151_v41 = vmax.f32 %v150_v39, 0.0 }
  0xaa   :  { %v53_v42 = vsel %vm38_vm1, %v52_v40, 0.0  ;;  %v155_v43 = vrot.slane %v151_v41, %v50_v33  ;;  %v86_v33 = vsub.s32 %v83_v32, %v349_v27 }
  0xab   :  { %54 = vadd.xlane.f32.xlu1 %v53_v42 }
  0xac   :  { %v156_v44 = vmul.f32 %v155_v43, %v23_v37 }
  0xae   :  { %v157_v45 = vsel %vm38_vm1, %v156_v44, 0.0 }
  0xaf   :  { %158 = vadd.xlane.f32.xlu1 %v157_v45 }
 0x134   :  { %v55_v48 = vpop.xlane.xlu1 %54 }
 0x135   :  { %v56_v49 = vadd.f32 %v55_v48, %v24_v47 }
 0x137   :  { %v58_v50 = vsel %vm57_vm2, %v56_v49, -inf }
 0x138   :  { %v59_v51 = vrot.slane %v58_v50, 4  ;;  %v159_v52 = vpop.xlane.xlu1 %158 }
 0x139   :  { %v160_v53 = vadd.f32 %v159_v52, %v24_v47  ;;  %v111_v47 = vunpack.c.l.s4 %v289_v46 }
 0x13a   :  { %v60_v54 = vmax.f32 %v58_v50, %v59_v51 }
 0x13b   :  { %v161_v55 = vsel %vm57_vm2, %v160_v53, -inf }
 0x13c   :  { %v61_v56 = vrot.slane %v60_v54, 2  ;;  %v162_v57 = vrot.slane %v161_v55, 4 }
 0x13e   :  { %v62_v58 = vmax.f32 %v60_v54, %v61_v56  ;;  %v163_v59 = vmax.f32 %v161_v55, %v162_v57  ;;  %v112_v57 = vunpack.c.0.s8 %v111_v47 }
 0x140   :  { %v63_v60 = vrot.slane %v62_v58, 1  ;;  %v164_v61 = vrot.slane %v163_v59, 2 }
 0x142   :  { %v64_v62 = vmax.f32 %v62_v58, %v63_v60  ;;  %v165_v63 = vmax.f32 %v163_v59, %v164_v61 }
 0x144   :  { %v65_v2 = vsub.f32 %v56_v49, %v64_v62  ;;  %v166_v3 = vrot.slane %v165_v63, 1 }
 0x146   :  { %v66_v4 = vmul.f32 1.442695, %v65_v2  ;;  %v167_v5 = vmax.f32 %v165_v63, %v166_v3  ;;  %v115_v2 = vsub.s32 %v112_v57, %v349_v27 }
 0x148   :  { %257 = vpow2.f32 %v66_v4  ;;  %v168_v6 = vsub.f32 %v160_v53, %v167_v5 }
 0x14a   :  { %v169_v7 = vmul.f32 1.442695, %v168_v6 }
 0x14c   :  { %259 = vpow2.f32 %v169_v7 }
 0x155   :  { %v258_v8 = vpop.eup %257 }
 0x156   :  { %v68_v9 = vsel %vm57_vm2, %v258_v8, 0.0 }
 0x157   :  { %v69_v10 = vrot.slane %v68_v9, 4 }
 0x159   :  { %v260_v11 = vpop.eup %259  ;;  %v70_v12 = vadd.f32 %v69_v10, %v68_v9 }
 0x15a   :  { %v171_v13 = vsel %vm57_vm2, %v260_v11, 0.0 }
 0x15b   :  { %v71_v14 = vrot.slane %v70_v12, 2  ;;  %v172_v15 = vrot.slane %v171_v13, 4 }
 0x15d   :  { %v72_v16 = vadd.f32 %v71_v14, %v70_v12  ;;  %v173_v17 = vadd.f32 %v172_v15, %v171_v13 }
 0x15f   :  { %v73_v18 = vrot.slane %v72_v16, 1  ;;  %v174_v19 = vrot.slane %v173_v17, 2 }
 0x161   :  { %v74_v20 = vadd.f32 %v73_v18, %v72_v16  ;;  %v175_v21 = vadd.f32 %v174_v19, %v173_v17 }
 0x163   :  { %261 = vrcp.f32 %v74_v20  ;;  %v176_v23 = vrot.slane %v175_v21, 1 }
 0x165   :  { %v177_v24 = vadd.f32 %v176_v23, %v175_v21 }
 0x167   :  { %263 = vrcp.f32 %v177_v24 }
 0x170   :  { %v262_v25 = vpop.eup %261 }
 0x171   :  { %v76_v26 = vmul.f32 %v262_v25, %v258_v8 }
 0x173   :  { %79 = vperm.xlu0 %253, %v76_v26  }
 0x174   :  { %v264_v28 = vpop.eup %263 }
 0x175   :  { %v179_v29 = vmul.f32 %v264_v28, %v260_v11 }
 0x177   :  { %182 = vperm.xlu1 %254, %v179_v29  }
 0x1ee   :  { %v80_v34 = vpop.permute.xlu0 %79 }
 0x1ef   :  { %v87_v35 = vrot.slane %v80_v34, %v86_v33 }
 0x1f1   :  { %v89_v36 = vmul.f32 %v87_v35, %v326_v0 }
 0x1f2   :  { %v183_v37 = vpop.permute.xlu1 %182 }
 0x1f3   :  { %v91_v38 = vcombine.high %v89_v36, %v89_v36  ;;  %v93_v39 = vsel %vm29_vm0, %v89_v36, 0.0  ;;  %v190_v40 = vrot.slane %v183_v37, %v86_v33 }
 0x1f4   :  { %v94_v41 = vrot.slane %v93_v39, 4 }
 0x1f5   :  { %v100_v42 = vsel %vm29_vm0, %v91_v38, 0.0  ;;  %v192_v43 = vmul.f32 %v331_v1, %v190_v40 }
 0x1f6   :  { %v95_v44 = vadd.f32 %v94_v41, %v93_v39  ;;  %v101_v45 = vrot.slane %v100_v42, 4 }
 0x1f7   :  { %v194_v48 = vcombine.high %v192_v43, %v192_v43  ;;  %v196_v49 = vsel %vm29_vm0, %v192_v43, 0.0 }
 0x1f8   :  { %v96_v50 = vrot.slane %v95_v44, 2  ;;  %v102_v51 = vadd.f32 %v101_v45, %v100_v42  ;;  %v197_v0 = vrot.slane %v196_v49, 4 }
 0x1f9   :  { %v203_v52 = vsel %vm29_vm0, %v194_v48, 0.0 }
 0x1fa   :  { %v97_v53 = vadd.f32 %v96_v50, %v95_v44  ;;  %v103_v54 = vrot.slane %v102_v51, 2  ;;  %v198_v55 = vadd.f32 %v197_v0, %v196_v49  ;;  %v204_v56 = vrot.slane %v203_v52, 4 }
 0x1fc   :  { %v98_v58 = vrot.slane %v97_v53, 1  ;;  %v104_v59 = vadd.f32 %v103_v54, %v102_v51  ;;  %v199_v1 = vrot.slane %v198_v55, 2  ;;  %v205_v60 = vadd.f32 %v204_v56, %v203_v52 }
 0x1fe   :  { %v105_v61 = vrot.slane %v104_v59, 1  ;;  %v200_v62 = vadd.f32 %v199_v1, %v198_v55  ;;  %v206_v63 = vrot.slane %v205_v60, 2  ;;  %v99_v3 = vadd.f32 %v98_v58, %v97_v53 }
 0x200   :  { %v106_v4 = vadd.f32 %v105_v61, %v104_v59  ;;  %v201_v5 = vrot.slane %v200_v62, 1  ;;  %v207_v6 = vadd.f32 %v206_v63, %v205_v60 }
 0x202   :  { %v109_v7 = vcombine.low %v99_v3, %v106_v4  ;;  %v208_v8 = vrot.slane %v207_v6, 1  ;;  %v202_v9 = vadd.f32 %v201_v5, %v200_v62 }
 0x204   :  { %v209_v10 = vadd.f32 %v208_v8, %v207_v6  ;;  %v116_v11 = vrot.slane %v109_v7, %v115_v2 }
 0x206   :  { %v212_v12 = vcombine.low %v202_v9, %v209_v10  ;;  %v123_v13 = vrot.slane %v116_v11, %v115_v2 }
 0x208   :  { %129 = vst.msk [vmem:[#allocation2] sm:$0x3] %vm127_vm3, %v123_v13  ;;  %v219_v14 = vrot.slane %v212_v12, %v115_v2 }
 0x20a   :  { %v226_v15 = vrot.slane %v219_v14, %v115_v2 }
 0x20c   :  { %229 = vst.msk [vmem:[#allocation2 + $0x2] sm:$0x3] %vm127_vm3, %v226_v15 }
 0x20d   :  { %276 = shalt.err (!%p273_p4)
}
 0x20e   :  { %s291_s28 = smov 32   ;;  %s292_s29 = smov 2  }
 0x20f   :  { %241 = dma.vmem_to_hbm [thread:$0]  %s236_s4, 64, %s384_s5, [#allocation3], %s291_s28, %s291_s28, %s292_s29  }
 0x210   :  { %285 = dma.done.wait [#allocation3], 64  }
 0x211   :  { %286 = vsyncadd [#allocation3], 4294967232 }
 0x212   :  { %245 = vsyncpa [#allocation3], 1 }

</bundles_post_ra>
